<compile_context>
chip_gen: v6e
topology: v6e:2x2x1
jax: 0.10.0
libtpu: 0.0.40
codegen_flags: <defaults>
</compile_context>

<pallas_src>
import functools

import jax
import jax.numpy as jnp
import numpy as np
from jax import lax
from jax.experimental import pallas as pl
from jax.experimental.pallas import tpu as pltpu


_VMEM_LIMIT = 48 * 1024 * 1024   # <= physical 64 MiB on v7x; ample headroom on v5e/v6e
_FUSE_BYTES = 4 * 1024 * 1024    # fused single-pass path when f32-equivalent x is small


def _pick_tile(total, want, row_bytes, budget):
    """Largest row-tile <= want that fits `budget` bytes; multiple of 8 unless full."""
    t = min(total, max(8, want))
    if t * row_bytes > budget:
        t = min(total, max(8, (budget // max(row_bytes, 1)) // 8 * 8))
    if t < total:
        t = max(8, (t // 8) * 8)
    return t


# --------------------------------------------------------------------------
# Fused fast path: x resident in VMEM, one HBM read, beta + z in one kernel.
# --------------------------------------------------------------------------
def _fused_kernel(x_ref, w_ref, b_ref, att_ref, z_ref, beta_ref):
    x = x_ref[...]                                                  # (M, N, H)
    n = x.shape[1]
    h = lax.dot_general(x, w_ref[...], (((2,), (1,)), ((), ())),    # x @ W.T
                        preferred_element_type=jnp.float32)
    t = jnp.tanh(h + b_ref[...].astype(jnp.float32))
    r = jnp.sum(t * att_ref[...].astype(jnp.float32), axis=2)       # (M, N)
    scores = jnp.sum(r, axis=1, keepdims=True) * (1.0 / n)          # mean over nodes
    m_max = jnp.max(scores, axis=0, keepdims=True)
    e = jnp.exp(scores - m_max)
    beta = e / jnp.sum(e, axis=0, keepdims=True)                    # (M, 1)
    beta_ref[...] = beta
    z = jnp.sum(x.astype(jnp.float32) * beta[:, :, None], axis=0)   # (N, H)
    z_ref[...] = z.astype(z_ref.dtype)


# --------------------------------------------------------------------------
# Phase 1: per-relation attention scores (streamed, lane-densified, 2-core split)
# --------------------------------------------------------------------------
def _beta_kernel(x_ref, w_ref, b_ref, att_ref, part_ref, *,
                 n_actual, pack, tnp, tiles_per_core):
    c = pl.program_id(0)   # core split of the node reduction (v7x megacore)
    s = pl.program_id(1)   # sequential node-tile loop ("arbitrary")

    @pl.when(s == 0)
    def _init():
        part_ref[...] = jnp.zeros_like(part_ref)

    x = x_ref[...]                                                  # (M, TNP, HP)
    h = lax.dot_general(x, w_ref[...], (((2,), (0,)), ((), ())),    # x @ W_big
                        preferred_element_type=jnp.float32)
    t = jnp.tanh(h + b_ref[...].astype(jnp.float32))
    r = jnp.sum(t * att_ref[...].astype(jnp.float32), axis=2)       # (M, TNP)

    # Mask packed rows past the real node count (ragged / fully-OOB edge tiles).
    base = (c * tiles_per_core + s) * tnp
    prow = base + lax.broadcasted_iota(jnp.int32, r.shape, 1)
    r = jnp.where(prow * pack < n_actual, r, 0.0)

    part_ref[...] += jnp.sum(r, axis=1, keepdims=True)              # (M, 1) partials


# --------------------------------------------------------------------------
# Phase 2: z = sum_m beta[m] * x[m]   (streamed, lane-dense when possible)
# --------------------------------------------------------------------------
def _z_kernel(beta_ref, x_ref, z_ref):
    beta = beta_ref[...].astype(jnp.float32)                        # (M, 1) resident
    z = jnp.sum(x_ref[...].astype(jnp.float32) * beta[:, :, None], axis=0)
    z_ref[...] = z.astype(z_ref.dtype)


# --------------------------------------------------------------------------
# Wrapper
# --------------------------------------------------------------------------
def agg_relation_attribute(x, w, b, att, *, tn=4096, tp=4096, fuse_bytes=_FUSE_BYTES):
    """x: (M, N, H) stacked embeds; w: (H, H) fc.weight (out x in); b, att: (1, H).

    Returns (z_mc (N, H), beta (M,)).  attn_drop == 0 -> dropout is identity.
    """
    M, N, H = x.shape
    out_dtype = x.dtype
    itemsize = jnp.dtype(x.dtype).itemsize

    # ---- Fast path: whole problem fits comfortably in VMEM -> one kernel. ----
    if M * N * H * 4 <= fuse_bytes:
        z, beta = pl.pallas_call(
            _fused_kernel,
            out_shape=(jax.ShapeDtypeStruct((N, H), out_dtype),
                       jax.ShapeDtypeStruct((M, 1), jnp.float32)),
            compiler_params=pltpu.CompilerParams(vmem_limit_bytes=_VMEM_LIMIT),
        )(x, w, b, att)
        return z, beta.reshape(-1)

    # ---- Phase 1: scores_m = sum_n att . tanh(fc(x[m, n])) --------------------
    # Lane densification: pack `pack` consecutive nodes per 128-lane row (free
    # row-major re-view) and apply fc via a block-diagonal kron(I_pack, W.T).
    if H < 128 and 128 % H == 0 and N % (128 // H) == 0:
        pack = 128 // H
    else:
        pack = 1
    hp = H * pack
    rows = N // pack
    if pack > 1:
        x1 = x.reshape(M, rows, hp)                         # free row-major re-view
        w1 = jnp.kron(jnp.eye(pack, dtype=w.dtype), w.T)    # (hp, hp) block-diagonal
        b1 = jnp.tile(b, (1, pack))
        att1 = jnp.tile(att, (1, pack))
    else:
        x1, w1, b1, att1 = x, w.T, b, att
    # TODO(synk): optional bf16 cast of x1/w1 for the MXU skipped to keep f32-exact beta.

    tnp = _pick_tile(rows, tn // pack, M * hp * itemsize, 4 * 1024 * 1024)
    n_tiles = pl.cdiv(rows, tnp)
    n_split = 2 if n_tiles > 1 else 1        # v7x: each TensorCore reduces half the tiles
    per_core = pl.cdiv(n_tiles, n_split)

    parts = pl.pallas_call(
        functools.partial(_beta_kernel, n_actual=N, pack=pack, tnp=tnp,
                          tiles_per_core=per_core),
        out_shape=jax.ShapeDtypeStruct((n_split, M, 1), jnp.float32),
        grid_spec=pltpu.PrefetchScalarGridSpec(
            num_scalar_prefetch=0,
            grid=(n_split, per_core),
            in_specs=[
                pl.BlockSpec((M, tnp, hp), lambda c, s: (0, c * per_core + s, 0)),
                pl.BlockSpec((hp, hp), lambda c, s: (0, 0)),
                pl.BlockSpec((1, hp), lambda c, s: (0, 0)),
                pl.BlockSpec((1, hp), lambda c, s: (0, 0)),
            ],
            out_specs=pl.BlockSpec((None, M, 1), lambda c, s: (c, 0, 0)),
        ),
        compiler_params=pltpu.CompilerParams(
            dimension_semantics=("parallel", "arbitrary"),
            vmem_limit_bytes=_VMEM_LIMIT,
        ),
    )(x1, w1, b1, att1)

    scores = jnp.sum(parts[:, :, 0], axis=0) * (1.0 / N)    # mean over nodes, (M,)
    beta = jax.nn.softmax(scores)                           # (M,)

    # ---- Phase 2: z = sum_m beta[m] * x[m], streamed lane-dense ---------------
    if (N * H) % 128 == 0:
        L, P = 128, (N * H) // 128
        x2 = x.reshape(M, P, L)                             # free row-major re-view
    else:
        L, P = H, N
        x2 = x

    tpp = _pick_tile(P, tp, M * L * itemsize, 8 * 1024 * 1024)
    p_tiles = pl.cdiv(P, tpp)

    z = pl.pallas_call(
        _z_kernel,
        out_shape=jax.ShapeDtypeStruct((P, L), out_dtype),  # exact: OOB edge writes dropped
        grid_spec=pltpu.PrefetchScalarGridSpec(
            num_scalar_prefetch=0,
            grid=(p_tiles,),
            in_specs=[
                pl.BlockSpec((M, 1), lambda p: (0, 0)),       # beta stays resident
                pl.BlockSpec((M, tpp, L), lambda p: (0, p, 0)),
            ],
            out_specs=pl.BlockSpec((tpp, L), lambda p: (p, 0)),
        ),
        compiler_params=pltpu.CompilerParams(
            dimension_semantics=("parallel",),
            vmem_limit_bytes=_VMEM_LIMIT,
        ),
    )(beta.reshape(M, 1), x2)

    z = z.reshape(N, H)
    return z, beta


# --------------------------------------------------------------------------
# Pure-JAX reference mirroring the PyTorch forward
# --------------------------------------------------------------------------
def _reference(x, w, b, att):
    h = jnp.tanh(jnp.einsum("mnh,kh->mnk", x, w,
                            precision=lax.Precision.HIGHEST) + b)     # (M, N, H)
    sp = jnp.mean(h, axis=1)                                          # (M, H)
    scores = jnp.sum(sp * att, axis=1)                                # (M,)
    beta = jax.nn.softmax(scores)                                     # (M,)
    z = jnp.sum(beta[:, None, None] * x, axis=0)                      # (N, H)
    return z, beta


def _make_inputs(M, N, H, seed=0):
    key = jax.random.PRNGKey(seed)
    k_x, k_w, k_b, k_a = jax.random.split(key, 4)
    x = jax.random.normal(k_x, (M, N, H), dtype=jnp.float32)
    gain = 1.414
    w_std = gain * np.sqrt(2.0 / (H + H))                   # xavier_normal_ on (H, H)
    w = w_std * jax.random.normal(k_w, (H, H), dtype=jnp.float32)
    bound = 1.0 / np.sqrt(H)                                # nn.Linear default bias init
    b = jax.random.uniform(k_b, (1, H), minval=-bound, maxval=bound, dtype=jnp.float32)
    a_std = gain * np.sqrt(2.0 / (1 + H))                   # xavier_normal_ on (1, H)
    att = a_std * jax.random.normal(k_a, (1, H), dtype=jnp.float32)
    # attn_drop = 0 -> dropout is identity (eval-mode behavior).
    # TODO(synk): the PyTorch print of beta is host-side logging; not reproduced.
    return x, w, b, att


if __name__ == "__main__":
    configs = [
        # (M, N, H, kwargs) -- kwargs force specific code paths for coverage.
        (3, 16, 32, {}),                                    # fused single-pass path
        (3, 1000, 32, dict(fuse_bytes=0, tn=256, tp=128)),  # 2-phase, pack=4, ragged tiles
        (3, 1001, 32, dict(fuse_bytes=0, tn=256, tp=128)),  # 2-phase, pack=1 fallback path
        (3, 20000, 32, {}),                                 # 2-phase, default tiles + core split
    ]
    for (M, N, H, kw) in configs:
        x, w, b, att = _make_inputs(M, N, H)
        z, beta = agg_relation_attribute(x, w, b, att, **kw)
        jax.block_until_ready(z)
        jax.block_until_ready(beta)
        z_ref, beta_ref = _reference(x, w, b, att)
        assert np.allclose(np.asarray(beta), np.asarray(beta_ref),
                           rtol=1e-5, atol=2e-5), f"beta mismatch for {(M, N, H)}"
        assert np.allclose(np.asarray(z), np.asarray(z_ref),
                           rtol=1e-5, atol=2e-5), f"z mismatch for {(M, N, H)}"
    print("KERNEL_OK")
</pallas_src>

<mosaic_0001>
module attributes {stable_mosaic.version = 11 : i64} {
  func.func @_fused_kernel(%arg0: memref<3x16x32xf32, #tpu.memory_space<vmem>>, %arg1: memref<32x32xf32, #tpu.memory_space<vmem>>, %arg2: memref<1x32xf32, #tpu.memory_space<vmem>>, %arg3: memref<1x32xf32, #tpu.memory_space<vmem>>, %arg4: memref<16x32xf32, #tpu.memory_space<vmem>>, %arg5: memref<3x1xf32, #tpu.memory_space<vmem>>) attributes {dimension_semantics = [], scalar_prefetch = 0 : i64, scratch_operands = 0 : i64, tpu.core_type = #tpu.core_type<tc>} {
    %c0 = arith.constant 0 : index
    %c0_0 = arith.constant 0 : index
    %c0_1 = arith.constant 0 : index
    %0 = vector.load %arg0[%c0, %c0_0, %c0_1] : memref<3x16x32xf32, #tpu.memory_space<vmem>>, vector<3x16x32xf32>
    %c0_2 = arith.constant 0 : index
    %c0_3 = arith.constant 0 : index
    %1 = vector.load %arg1[%c0_2, %c0_3] : memref<32x32xf32, #tpu.memory_space<vmem>>, vector<32x32xf32>
    %cst = arith.constant dense<0.000000e+00> : vector<3x16x32xf32>
    %2 = tpu.matmul %0, %1, %cst {dimension_numbers = #tpu.dot_dimension_numbers<[2], [1], [0, 1], [0], [0, 0, 0, 1, 1, 0], [], []>} : vector<3x16x32xf32>, vector<32x32xf32>, vector<3x16x32xf32> -> vector<3x16x32xf32>
    %c0_4 = arith.constant 0 : index
    %c0_5 = arith.constant 0 : index
    %3 = vector.load %arg2[%c0_4, %c0_5] : memref<1x32xf32, #tpu.memory_space<vmem>>, vector<1x32xf32>
    %4 = vector.shape_cast %3 : vector<1x32xf32> to vector<1x1x32xf32>
    %5 = vector.broadcast %4 : vector<1x1x32xf32> to vector<3x16x32xf32>
    %6 = arith.addf %2, %5 : vector<3x16x32xf32>
    %7 = math.tanh %6 : vector<3x16x32xf32>
    %c0_6 = arith.constant 0 : index
    %c0_7 = arith.constant 0 : index
    %8 = vector.load %arg3[%c0_6, %c0_7] : memref<1x32xf32, #tpu.memory_space<vmem>>, vector<1x32xf32>
    %9 = vector.shape_cast %8 : vector<1x32xf32> to vector<1x1x32xf32>
    %10 = vector.broadcast %9 : vector<1x1x32xf32> to vector<3x16x32xf32>
    %11 = arith.mulf %7, %10 : vector<3x16x32xf32>
    %cst_8 = arith.constant dense<0.000000e+00> : vector<3x16xf32>
    %12 = vector.multi_reduction <add>, %11, %cst_8 [2] : vector<3x16x32xf32> to vector<3x16xf32>
    %cst_9 = arith.constant dense<0.000000e+00> : vector<3xf32>
    %13 = vector.multi_reduction <add>, %12, %cst_9 [1] : vector<3x16xf32> to vector<3xf32>
    %14 = vector.shape_cast %13 : vector<3xf32> to vector<3x1xf32>
    %cst_10 = arith.constant 6.250000e-02 : f32
    %15 = vector.broadcast %cst_10 : f32 to vector<3x1xf32>
    %16 = arith.mulf %14, %15 : vector<3x1xf32>
    %cst_11 = arith.constant dense<0xFF800000> : vector<1xf32>
    %17 = vector.multi_reduction <maximumf>, %16, %cst_11 [0] : vector<3x1xf32> to vector<1xf32>
    %18 = vector.shape_cast %17 : vector<1xf32> to vector<1x1xf32>
    %19 = vector.broadcast %18 : vector<1x1xf32> to vector<3x1xf32>
    %20 = arith.subf %16, %19 : vector<3x1xf32>
    %21 = math.exp %20 : vector<3x1xf32>
    %cst_12 = arith.constant dense<0.000000e+00> : vector<1xf32>
    %22 = vector.multi_reduction <add>, %21, %cst_12 [0] : vector<3x1xf32> to vector<1xf32>
    %23 = vector.shape_cast %22 : vector<1xf32> to vector<1x1xf32>
    %24 = vector.broadcast %23 : vector<1x1xf32> to vector<3x1xf32>
    %25 = arith.divf %21, %24 : vector<3x1xf32>
    %c0_13 = arith.constant 0 : index
    %c0_14 = arith.constant 0 : index
    %26 = vector.load %arg5[%c0_13, %c0_14] : memref<3x1xf32, #tpu.memory_space<vmem>>, vector<3x1xf32>
    tpu.vector_store %arg5[%c0_13, %c0_14], %25 {strides = array<i32>} : memref<3x1xf32, #tpu.memory_space<vmem>>, vector<3x1xf32>,
    %27 = vector.shape_cast %25 : vector<3x1xf32> to vector<3x1x1xf32>
    %28 = vector.broadcast %27 : vector<3x1x1xf32> to vector<3x16x32xf32>
    %29 = arith.mulf %0, %28 : vector<3x16x32xf32>
    %cst_15 = arith.constant dense<0.000000e+00> : vector<16x32xf32>
    %30 = vector.multi_reduction <add>, %29, %cst_15 [0] : vector<3x16x32xf32> to vector<16x32xf32>
    %c0_16 = arith.constant 0 : index
    %c0_17 = arith.constant 0 : index
    %31 = vector.load %arg4[%c0_16, %c0_17] : memref<16x32xf32, #tpu.memory_space<vmem>>, vector<16x32xf32>
    tpu.vector_store %arg4[%c0_16, %c0_17], %30 {strides = array<i32>} : memref<16x32xf32, #tpu.memory_space<vmem>>, vector<16x32xf32>,
    return
  }
}

</mosaic_0001>

<bundles_post_ra>
// kernel: tpu_custom_call.1
= control target key start
LH: loop header
LB: loop body
LE: loop exit
PB: predicated region body
PF: predicated region fallthrough
CT: control target
= control target key end

     0   :  { %11 = vsyncpa [#allocation3], 0  ;;  %s609_s0 = inlined_call_operand.hbm [shape: f32[3,16,32], index: 0, kind: input, shape index: {}]   ;;  %s610_s1 = inlined_call_operand.hbm [shape: f32[32,32], index: 1, kind: input, shape index: {}]   ;;  %s611_s2 = inlined_call_operand.vmem [shape: f32[1,32], index: 2, kind: input, shape index: {}]   ;;  %s612_s3 = inlined_call_operand.vmem [shape: f32[1,32], index: 3, kind: input, shape index: {}]   ;;  %s613_s4 = inlined_call_operand.hbm [shape: f32[16,32], index: 4, kind: output, shape index: {0}]   ;;  %s614_s5 = inlined_call_operand.vmem [shape: f32[3,1], index: 5, kind: output, shape index: {1}]  }
   0x1   :  { %12 = vsyncpa [#allocation6], 0 }
   0x2   :  { %13 = vsyncpa [#allocation4], 0  ;;  %s487_s18 = smov [#allocation2]  }
   0x3   :  { %s19_s19 = sshll.u32 %s487_s18, 4  ;;  %s20_s19 = int_to_ptr.vmem [resolvable:$true] %s19_s19 }
   0x4   :  { %s429_s20 = scalar_lea.vmem %s20_s19, 768  ;;  %p434_p1 = scmp.lt.s32.totalorder %s20_s19, %s20_s19 }
   0x5   :  { %p430_p0 = scmp.ne.s32.totalorder %s20_s19, %s429_s20  ;;  %p435_p2 = scmp.lt.s32.totalorder %s429_s20, %s429_s20 }
   0x7   :  { %p436_p3 = por %p435_p2, %p434_p1 }
   0x9   :  { %p437_p4 = pnand %p436_p3, %p430_p0 }
   0xb   :  { %440 = shalt.err (!%p437_p4)
}
   0xc   :  { %s488_s21 = smov 128   ;;  %s489_s22 = smov 8  }
   0xd   :  { %25 = dma.hbm_to_vmem [thread:$0]  %s609_s0, 768, %s20_s19, [#allocation3], %s488_s21, %s488_s21, %s489_s22  }
   0xe   :  { %s490_s25 = smov [#allocation5]  }
   0xf   :  { %s31_s26 = sshll.u32 %s490_s25, 4  ;;  %s32_s26 = int_to_ptr.vmem [resolvable:$true] %s31_s26 }
  0x10   :  { %s449_s27 = scalar_lea.vmem %s32_s26, 512  ;;  %p454_p6 = scmp.lt.s32.totalorder %s32_s26, %s32_s26 }
  0x11   :  { %p450_p5 = scmp.ne.s32.totalorder %s32_s26, %s449_s27  ;;  %p455_p7 = scmp.lt.s32.totalorder %s449_s27, %s449_s27 }
  0x13   :  { %p456_p8 = por %p455_p7, %p454_p6 }
  0x15   :  { %p457_p9 = pnand %p456_p8, %p450_p5 }
  0x17   :  { %460 = shalt.err (!%p457_p9)
}
  0x18   :  { %37 = dma.hbm_to_vmem [thread:$0]  %s610_s1, 512, %s32_s26, [#allocation6], %s488_s21, %s488_s21, %s489_s22  }
  0x19   :  { %481 = dma.done.wait [#allocation3], 768  }
  0x1a   :  { %482 = vsyncadd [#allocation3], 4294966528 }
  0x1b   :  { %483 = dma.done.wait [#allocation6], 512  }
  0x1c   :  { %484 = vsyncadd [#allocation6], 4294966784  ;;  %vm65_vm0 = vcmask 261120   ;;  %v57_v0 = vld [vmem:[#allocation5 + $0x18] sm:$0xff]  ;;  %v56_v1 = vld [vmem:[#allocation5 + $0x10] sm:$0xff]  ;;  %v234_v42 = vlaneseq  ;;  %vm245_vm1 = vcmask 130112  }
  0x1d   :  { %375 = vmatprep.subr.msk.mxu0 %vm65_vm0, %v57_v0  ;;  %392 = vmatprep.subr.msk.mxu1 %vm65_vm0, %v57_v0  ;;  %v536_v2 = vld [vmem:[#allocation2] sm:$0xff]  ;;  %v538_v3 = vld [vmem:[#allocation2 + $0x10] sm:$0xff]  ;;  %v55_v4 = vld [vmem:[#allocation5 + $0x8] sm:$0xff]  ;;  %vm265_vm2 = vcmask 1041409   ;;  %vm267_vm3 = vcmask 1042434   ;;  %vm270_vm4 = vcmask 124928  }
  0x1e   :  { %376 = vmatpush3.xpose.msk.msra.mxu0 %vm65_vm0, %v57_v0  ;;  %396 = vmatpush3.xpose.msk.msra.mxu1 %vm65_vm0, %v57_v0  ;;  %v54_v5 = vld [vmem:[#allocation5] sm:$0xff]  ;;  %v558_v6 = vld [vmem:[#allocation2 + $0x8] sm:$0xff]  ;;  %v560_v7 = vld [vmem:[#allocation2 + $0x18] sm:$0xff]  ;;  %v235_v43 = vand.u32 127, %v234_v42  ;;  %v237_v44 = vshrl.u32 %v234_v42, 7  ;;  %vm275_vm5 = vcmask 1042432  }
  0x1f   :  { %377 = vmatprep.subr.msk.mxu0 %vm65_vm0, %v56_v1  ;;  %393 = vmatprep.subr.msk.mxu1 %vm65_vm0, %v56_v1  ;;  %v562_v8 = vld [vmem:[#allocation2 + $0x20] sm:$0xff]  ;;  %v570_v9 = vld [vmem:[#allocation2 + $0x28] sm:$0xff]  ;;  %vm295_vm6 = vcmask 2048  }
  0x20   :  { %383 = vmatprep.mubr.msk.f32.mxu0 %vm65_vm0, %v536_v2  ;;  %386 = vmatprep.mubr.msk.f32.mxu1 %vm65_vm0, %v538_v3  ;;  %v353_v10 = vld [vmem:[%s611_s2] ss:$0 sm:$0xff]  ;;  %v240_v45 = vadd.s32 4294967288, %v235_v43  ;;  %v238_v48 = vsub.s32 %v235_v43, %v237_v44 }
  0x21   :  { %v364_v23 = vld [vmem:[%s612_s3] ss:$0 sm:$0xff] }
  0x22   :  { %378 = vmatpush3.xpose.msk.msra.mxu0 %vm65_vm0, %v56_v1  ;;  %397 = vmatpush3.xpose.msk.msra.mxu1 %vm65_vm0, %v56_v1  ;;  %v243_v49 = vsub.s32 %v240_v45, %v237_v44 }
  0x23   :  { %379 = vmatprep.subr.msk.mxu0 %vm65_vm0, %v55_v4  ;;  %394 = vmatprep.subr.msk.mxu1 %vm65_vm0, %v55_v4 }
  0x26   :  { %380 = vmatpush3.xpose.msk.msra.mxu0 %vm65_vm0, %v55_v4  ;;  %398 = vmatpush3.xpose.msk.msra.mxu1 %vm65_vm0, %v55_v4 }
  0x27   :  { %381 = vmatprep.subr.msk.mxu0 %vm65_vm0, %v54_v5  ;;  %395 = vmatprep.subr.msk.mxu1 %vm65_vm0, %v54_v5 }
  0x2a   :  { %382 = vmatpush3.xpose.msk.msra.mxu0 %vm65_vm0, %v54_v5  ;;  %399 = vmatpush3.xpose.msk.msra.mxu1 %vm65_vm0, %v54_v5 }
  0x2d   :  { %384 = vmatmul.mubr.msk.f32.vlgmr.msra.gmra.mxu0 %vm65_vm0, %v558_v6  ;;  %387 = vmatmul.mubr.msk.f32.vlgmr.msra.gmra.mxu1 %vm65_vm0, %v560_v7 }
  0x2e   :  { %389 = vmatprep.mubr.msk.f32.mxu1 %vm65_vm0, %v562_v8 }
  0x31   :  { %390 = vmatmul.mubr.msk.f32.gmra.mxu1 %vm65_vm0, %v570_v9 }
  0xed   :  { %v385_v11 = vpop.f32.mrf.mxu0  ;;  %v388_v12 = vpop.f32.mrf.mxu1 }
  0xee   :  { %v168_v13 = vadd.f32 %v385_v11, %v353_v10  ;;  %v178_v14 = vadd.f32 %v388_v12, %v353_v10 }
  0xef   :  { %v162_v15 = vpop.f32.mrf.mxu0  ;;  %v172_v16 = vpop.f32.mrf.mxu1 }
  0xf0   :  { %405 = vtanh.f32 %v168_v13  ;;  %v163_v17 = vadd.f32 %v353_v10, %v162_v15  ;;  %v173_v18 = vadd.f32 %v353_v10, %v172_v16 }
  0xf1   :  { %407 = vtanh.f32 %v178_v14  ;;  %v391_v19 = vpop.f32.mrf.mxu1 }
  0xf2   :  { %409 = vtanh.f32 %v163_v17  ;;  %v188_v20 = vadd.f32 %v391_v19, %v353_v10 }
  0xf3   :  { %411 = vtanh.f32 %v173_v18  ;;  %v182_v21 = vpop.f32.mrf.mxu1 }
  0xf4   :  { %v183_v22 = vadd.f32 %v353_v10, %v182_v21  ;;  %413 = vtanh.f32 %v188_v20 }
  0xf6   :  { %415 = vtanh.f32 %v183_v22 }
  0xfd   :  { %v406_v24 = vpop.eup %405 }
  0xfe   :  { %v408_v25 = vpop.eup %407  ;;  %v205_v26 = vmul.f32 %v406_v24, %v364_v23 }
  0xff   :  { %v410_v27 = vpop.eup %409  ;;  %v207_v28 = vmul.f32 %v408_v25, %v364_v23 }
 0x100   :  { %v412_v29 = vpop.eup %411  ;;  %v213_v30 = vsel %vm65_vm0, %v205_v26, 0.0  ;;  %v204_v31 = vmul.f32 %v410_v27, %v364_v23  ;;  %v300_v27 = vsub.s32 0, %v237_v44 }
 0x101   :  { %v219_v32 = vsel %vm65_vm0, %v207_v28, 0.0  ;;  %214 = vadd.xlane.f32.xlu0 %v213_v30  ;;  %v206_v33 = vmul.f32 %v412_v29, %v364_v23  ;;  %v414_v34 = vpop.eup %413  ;;  %v304_v28 = vsub.s32 1, %v237_v44  ;;  %v308_v29 = vsub.s32 2, %v237_v44 }
 0x102   :  { %220 = vadd.xlane.f32.xlu1 %v219_v32  ;;  %v210_v36 = vsel %vm65_vm0, %v204_v31, 0.0  ;;  %v209_v39 = vmul.f32 %v414_v34, %v364_v23 }
 0x103   :  { %v416_v35 = vpop.eup %415  ;;  %v216_v38 = vsel %vm65_vm0, %v206_v33, 0.0 }
 0x104   :  { %v208_v37 = vmul.f32 %v416_v35, %v364_v23  ;;  %v225_v41 = vsel %vm65_vm0, %v209_v39, 0.0 }
 0x105   :  { %211 = vadd.xlane.f32.xlu0 %v210_v36 }
 0x106   :  { %217 = vadd.xlane.f32.xlu1 %v216_v38  ;;  %v222_v40 = vsel %vm65_vm0, %v208_v37, 0.0 }
 0x109   :  { %223 = vadd.xlane.f32.xlu0 %v222_v40 }
 0x10a   :  { %226 = vadd.xlane.f32.xlu1 %v225_v41 }
 0x18a   :  { %v215_v46 = vpop.xlane.xlu0 %214 }
 0x18b   :  { %v221_v47 = vpop.xlane.xlu1 %220  ;;  %v244_v55 = vrot.slane %v215_v46, %v243_v49 }
 0x18c   :  { %v254_v54 = vrot.slane %v221_v47, %v243_v49 }
 0x18e   :  { %v212_v50 = vpop.xlane.xlu0 %211 }
 0x18f   :  { %v218_v51 = vpop.xlane.xlu1 %217  ;;  %v239_v52 = vrot.slane %v212_v50, %v238_v48 }
 0x190   :  { %v250_v53 = vrot.slane %v218_v51, %v238_v48 }
 0x191   :  { %v246_v58 = vsel %vm245_vm1, %v244_v55, %v239_v52 }
 0x192   :  { %v224_v56 = vpop.xlane.xlu0 %223  ;;  %v255_v57 = vsel %vm245_vm1, %v254_v54, %v250_v53 }
 0x193   :  { %v227_v59 = vpop.xlane.xlu1 %226  ;;  %v259_v60 = vrot.slane %v224_v56, %v238_v48  ;;  %v266_v63 = vsel %vm265_vm2, %v255_v57, %v246_v58 }
 0x194   :  { %v263_v61 = vrot.slane %v227_v59, %v243_v49 }
 0x196   :  { %v264_v62 = vsel %vm245_vm1, %v263_v61, %v259_v60 }
 0x197   :  { %v268_v0 = vsel %vm267_vm3, %v264_v62, %v266_v63 }
 0x198   :  { %v271_v1 = vsel %vm270_vm4, %v268_v0, 0.0 }
 0x199   :  { %272 = vadd.xlane.f32.xlu0 %v271_v1 }
 0x222   :  { %v273_v4 = vpop.xlane.xlu0 %272 }
 0x223   :  { %v274_v5 = vmul.f32 0.0625, %v273_v4 }
 0x225   :  { %v276_v10 = vsel %vm275_vm5, %v274_v5, -inf }
 0x226   :  { %v277_v11 = vrot.slane %v276_v10, 4 }
 0x228   :  { %v278_v12 = vmax.f32 %v276_v10, %v277_v11 }
 0x22a   :  { %v279_v13 = vrot.slane %v278_v12, 2 }
 0x22c   :  { %v280_v14 = vmax.f32 %v278_v12, %v279_v13 }
 0x22e   :  { %v281_v15 = vrot.slane %v280_v14, 1 }
 0x230   :  { %v282_v16 = vmax.f32 %v280_v14, %v281_v15 }
 0x232   :  { %v283_v17 = vsub.f32 %v274_v5, %v282_v16 }
 0x234   :  { %v284_v18 = vmul.f32 1.442695, %v283_v17 }
 0x236   :  { %417 = vpow2.f32 %v284_v18 }
 0x243   :  { %v418_v19 = vpop.eup %417 }
 0x244   :  { %v286_v20 = vsel %vm275_vm5, %v418_v19, 0.0 }
 0x245   :  { %v287_v21 = vrot.slane %v286_v20, 4 }
 0x247   :  { %v288_v22 = vadd.f32 %v287_v21, %v286_v20 }
 0x249   :  { %v289_v23 = vrot.slane %v288_v22, 2 }
 0x24b   :  { %v290_v24 = vadd.f32 %v289_v23, %v288_v22 }
 0x24d   :  { %v291_v25 = vrot.slane %v290_v24, 1 }
 0x24f   :  { %v292_v26 = vadd.f32 %v291_v25, %v290_v24 }
 0x251   :  { %419 = vrcp.f32 %v292_v26 }
 0x25e   :  { %v420_v30 = vpop.eup %419 }
 0x25f   :  { %v294_v31 = vmul.f32 %v420_v30, %v418_v19 }
 0x261   :  { %296 = vst.msk [vmem:[%s614_s5] sm:$0x7] %vm295_vm6, %v294_v31  ;;  %v301_v32 = vrot.slane %v294_v31, %v300_v27  ;;  %v305_v33 = vrot.slane %v294_v31, %v304_v28  ;;  %v309_v34 = vrot.slane %v294_v31, %v308_v29  ;;  %s491_s5 = smov [#allocation7]  }
 0x262   :  { %s336_s7 = sshll.u32 %s491_s5, 4  ;;  %s337_s7 = int_to_ptr.vmem [resolvable:$true] %s336_s7 }
 0x263   :  { %v313_v35 = vmul.f32 %v301_v32, %v536_v2  ;;  %v314_v36 = vmul.f32 %v301_v32, %v558_v6  ;;  %v315_v37 = vmul.f32 %v305_v33, %v538_v3  ;;  %v316_v38 = vmul.f32 %v305_v33, %v560_v7  ;;  %s461_s8 = scalar_lea.vmem %s337_s7, 256  ;;  %p466_p11 = scmp.lt.s32.totalorder %s337_s7, %s337_s7 }
 0x264   :  { %v317_v39 = vmul.f32 %v309_v34, %v562_v8  ;;  %v318_v40 = vmul.f32 %v309_v34, %v570_v9  ;;  %p462_p10 = scmp.ne.s32.totalorder %s337_s7, %s461_s8  ;;  %p467_p12 = scmp.lt.s32.totalorder %s461_s8, %s461_s8 }
 0x265   :  { %v319_v41 = vsel %vm65_vm0, %v313_v35, 0.0  ;;  %v320_v42 = vsel %vm65_vm0, %v315_v37, 0.0  ;;  %v324_v43 = vsel %vm65_vm0, %v314_v36, 0.0  ;;  %v325_v44 = vsel %vm65_vm0, %v316_v38, 0.0 }
 0x266   :  { %v321_v2 = vadd.f32 %v320_v42, %v319_v41  ;;  %v326_v6 = vadd.f32 %v325_v44, %v324_v43  ;;  %v322_v3 = vsel %vm65_vm0, %v317_v39, 0.0  ;;  %v327_v7 = vsel %vm65_vm0, %v318_v40, 0.0  ;;  %p468_p13 = por %p467_p12, %p466_p11 }
 0x268   :  { %v323_v45 = vadd.f32 %v322_v3, %v321_v2  ;;  %v328_v8 = vadd.f32 %v327_v7, %v326_v6  ;;  %p469_p0 = pnand %p468_p13, %p462_p10 }
 0x26a   :  { %329 = vst.msk [vmem:[#allocation7] sm:$0xff] %vm65_vm0, %v323_v45  ;;  %330 = vst.msk [vmem:[#allocation7 + $0x8] sm:$0xff] %vm65_vm0, %v328_v8 }
 0x26b   :  { %472 = shalt.err (!%p469_p0)
}
 0x26c   :  { %342 = dma.vmem_to_hbm [thread:$0]  %s337_s7, 256, %s613_s4, [#allocation4], %s488_s21, %s488_s21, %s489_s22  }
 0x26d   :  { %485 = dma.done.wait [#allocation4], 256  }
 0x26e   :  { %486 = vsyncadd [#allocation4], 4294967040 }
 0x26f   :  { %350 = vsyncpa [#allocation3], 1 }
 0x270   :  { %351 = vsyncpa [#allocation6], 1 }
 0x271   :  { %352 = vsyncpa [#allocation4], 1 }

</bundles_post_ra>
